<compile_context>
chip_gen: v5e
topology: v5e:2x2
jax: 0.10.0
libtpu: 0.0.40
codegen_flags: <defaults>
</compile_context>

<pallas_src>
import functools

import jax
import jax.numpy as jnp
from jax.experimental import pallas as pl
from jax.experimental.pallas import tpu as pltpu


def _round_up(x, m):
    return ((x + m - 1) // m) * m


def _classifier_kernel(x_ref, w1_ref, b1_ref, w2_ref, b2_ref, o_ref):
    # fc1: [TB, in] @ [in, hidden] -> f32 accumulate
    h = jnp.dot(x_ref[...], w1_ref[...], preferred_element_type=jnp.float32)
    # bias + ReLU epilogue in f32 (v5e VPU has no bf16)
    h = jnp.maximum(h + b1_ref[...], 0.0)
    # fc2: [TB, hidden] @ [hidden, n_pad] -> f32 accumulate (lane-dense n_pad)
    out = jnp.dot(h.astype(w2_ref.dtype), w2_ref[...],
                  preferred_element_type=jnp.float32)
    o_ref[...] = (out + b2_ref[...]).astype(o_ref.dtype)


def classifier_forward(x, w1, b1, w2, b2, *, block_b=512, compute_dtype=None,
                       vmem_limit_bytes=None):
    """x: [B, input_size]; w1: [input_size, hidden]; b1: [1, hidden];
    w2: [hidden, n_class]; b2: [1, n_class] -> [B, n_class].

    compute_dtype: optional MXU input dtype (e.g. jnp.bfloat16 on v6e/v7x).
    Accumulation is always f32; bias/ReLU epilogue is always f32.
    """
    B, in_dim = x.shape
    hidden = w1.shape[1]
    n_class = w2.shape[1]
    cdt = jnp.dtype(compute_dtype) if compute_dtype is not None else x.dtype
    out_dtype = x.dtype

    # --- wrapper-side layout plumbing -------------------------------------
    # Lane-dense output: pad n_class up to a multiple of 128.
    n_pad = _round_up(n_class, 128)
    # Batch tile: multiple of 8 (sublane), capped at block_b; pad B so the
    # grid divides evenly.
    tb = min(block_b, _round_up(B, 8))
    b_pad = _round_up(B, tb)

    xp = x.astype(cdt)
    if b_pad != B:
        xp = jnp.pad(xp, ((0, b_pad - B), (0, 0)))
    w1p = w1.astype(cdt)
    w2p = w2.astype(cdt)
    b1p = b1.astype(jnp.float32).reshape(1, hidden)
    b2p = b2.astype(jnp.float32).reshape(1, n_class)
    if n_pad != n_class:
        w2p = jnp.pad(w2p, ((0, 0), (0, n_pad - n_class)))
        b2p = jnp.pad(b2p, ((0, 0), (0, n_pad - n_class)))

    # --- VMEM budget: resident weights + double-buffered x/out tiles ------
    isz = jnp.dtype(cdt).itemsize
    osz = jnp.dtype(out_dtype).itemsize
    weight_bytes = (w1p.size + w2p.size) * isz + (b1p.size + b2p.size) * 4
    tile_bytes = 2 * (tb * in_dim * isz + tb * n_pad * osz)  # 2x: double buffer
    if vmem_limit_bytes is None:
        vmem_limit_bytes = min(64 << 20,
                               max(16 << 20, weight_bytes + tile_bytes + (4 << 20)))
    # TODO(synk): if weights alone exceed ~64 MiB (v7x VMEM), add a K-reduction
    # grid axis with a VMEM f32 accumulator instead of keeping w1 fully resident.

    cost = pl.CostEstimate(
        flops=2 * b_pad * (in_dim * hidden + hidden * n_pad),
        transcendentals=0,
        bytes_accessed=(xp.size * isz + (w1p.size + w2p.size) * isz
                        + (b1p.size + b2p.size) * 4 + b_pad * n_pad * osz),
    )

    grid = (pl.cdiv(b_pad, tb),)

    out_padded = pl.pallas_call(
        _classifier_kernel,
        out_shape=jax.ShapeDtypeStruct((b_pad, n_pad), out_dtype),
        grid_spec=pltpu.PrefetchScalarGridSpec(
            num_scalar_prefetch=0,
            grid=grid,
            in_specs=[
                # activation tile: walks the batch
                pl.BlockSpec((tb, in_dim), lambda i: (i, 0)),
                # weights / biases: constant index_map -> stay VMEM-resident
                pl.BlockSpec((in_dim, hidden), lambda i: (0, 0)),
                pl.BlockSpec((1, hidden), lambda i: (0, 0)),
                pl.BlockSpec((hidden, n_pad), lambda i: (0, 0)),
                pl.BlockSpec((1, n_pad), lambda i: (0, 0)),
            ],
            out_specs=pl.BlockSpec((tb, n_pad), lambda i: (i, 0)),
        ),
        compiler_params=pltpu.CompilerParams(
            dimension_semantics=("parallel",),
            vmem_limit_bytes=int(vmem_limit_bytes),
        ),
        cost_estimate=cost,
    )(xp, w1p, b1p, w2p, b2p)

    return out_padded[:B, :n_class]


def init_classifier_params(key, input_size, hidden, n_class, dtype=jnp.float32):
    """Mirrors weights_init: Linear weights ~ N(0, 0.02), biases = 0.
    Weights are stored transposed ([in, out]) relative to PyTorch's [out, in]."""
    k1, k2 = jax.random.split(key)
    w1 = (0.02 * jax.random.normal(k1, (input_size, hidden))).astype(dtype)
    b1 = jnp.zeros((1, hidden), dtype=dtype)
    w2 = (0.02 * jax.random.normal(k2, (hidden, n_class))).astype(dtype)
    b2 = jnp.zeros((1, n_class), dtype=dtype)
    return w1, b1, w2, b2


def _ref_forward(x, w1, b1, w2, b2):
    h = jnp.maximum(
        jnp.dot(x, w1, precision=jax.lax.Precision.HIGHEST) + b1, 0.0)
    return jnp.dot(h, w2, precision=jax.lax.Precision.HIGHEST) + b2


if __name__ == "__main__":
    # --- small shapes consistent with Classifier(input_size, hidden, n_class)
    batch, input_size, hidden, n_class = 8, 32, 32, 8

    key = jax.random.PRNGKey(0)
    kx, kp, kx2, kp2 = jax.random.split(key, 4)
    x = jax.random.normal(kx, (batch, input_size), dtype=jnp.float32)
    w1, b1, w2, b2 = init_classifier_params(kp, input_size, hidden, n_class)

    fwd = jax.jit(functools.partial(classifier_forward, block_b=512))
    out = fwd(x, w1, b1, w2, b2)
    jax.block_until_ready(out)

    ref = _ref_forward(x, w1, b1, w2, b2)
    assert out.shape == (batch, n_class)
    assert jnp.allclose(out, ref, atol=1e-5, rtol=1e-5), "small-shape mismatch"

    # --- larger case: exercises batch tiling (grid=2), padding & lane padding
    B2, in2, hid2, nc2 = 1000, 256, 512, 10
    x2 = jax.random.normal(kx2, (B2, in2), dtype=jnp.float32)
    w1b, b1b, w2b, b2b = init_classifier_params(kp2, in2, hid2, nc2)
    out2 = fwd(x2, w1b, b1b, w2b, b2b)
    jax.block_until_ready(out2)
    ref2 = _ref_forward(x2, w1b, b1b, w2b, b2b)
    assert out2.shape == (B2, nc2)
    assert jnp.allclose(out2, ref2, atol=1e-2, rtol=1e-2), "tiled-shape mismatch"

    print("KERNEL_OK")
</pallas_src>

<mosaic_0001>
module attributes {stable_mosaic.version = 11 : i64} {
  func.func @_classifier_kernel(%arg0: i32, %arg1: memref<8x32xf32, #tpu.memory_space<vmem>>, %arg2: memref<32x32xf32, #tpu.memory_space<vmem>>, %arg3: memref<1x32xf32, #tpu.memory_space<vmem>>, %arg4: memref<32x128xf32, #tpu.memory_space<vmem>>, %arg5: memref<1x128xf32, #tpu.memory_space<vmem>>, %arg6: memref<8x128xf32, #tpu.memory_space<vmem>>) attributes {dimension_semantics = [#tpu.dimension_semantics<parallel>], iteration_bounds = array<i64: 1>, scalar_prefetch = 0 : i64, scratch_operands = 0 : i64, tpu.core_type = #tpu.core_type<tc>, window_params = [{transform_indices = @transform_0, window_bounds = array<i64: 8, 32>}, {pipeline_mode = #tpu.pipeline_mode<synchronous>, transform_indices = @transform_1, window_bounds = array<i64: 32, 32>}, {pipeline_mode = #tpu.pipeline_mode<synchronous>, transform_indices = @transform_2, window_bounds = array<i64: 1, 32>}, {pipeline_mode = #tpu.pipeline_mode<synchronous>, transform_indices = @transform_3, window_bounds = array<i64: 32, 128>}, {pipeline_mode = #tpu.pipeline_mode<synchronous>, transform_indices = @transform_4, window_bounds = array<i64: 1, 128>}, {transform_indices = @transform_5, window_bounds = array<i64: 8, 128>}]} {
    %c0 = arith.constant 0 : index
    %c0_0 = arith.constant 0 : index
    %0 = vector.load %arg1[%c0, %c0_0] : memref<8x32xf32, #tpu.memory_space<vmem>>, vector<8x32xf32>
    %c0_1 = arith.constant 0 : index
    %c0_2 = arith.constant 0 : index
    %1 = vector.load %arg2[%c0_1, %c0_2] : memref<32x32xf32, #tpu.memory_space<vmem>>, vector<32x32xf32>
    %cst = arith.constant dense<0.000000e+00> : vector<8x32xf32>
    %2 = tpu.matmul %0, %1, %cst {dimension_numbers = #tpu.dot_dimension_numbers<[1], [0], [0], [1], [0, 0, 1, 1], [], []>} : vector<8x32xf32>, vector<32x32xf32>, vector<8x32xf32> -> vector<8x32xf32>
    %c0_3 = arith.constant 0 : index
    %c0_4 = arith.constant 0 : index
    %3 = vector.load %arg3[%c0_3, %c0_4] : memref<1x32xf32, #tpu.memory_space<vmem>>, vector<1x32xf32>
    %4 = vector.broadcast %3 : vector<1x32xf32> to vector<8x32xf32>
    %5 = arith.addf %2, %4 : vector<8x32xf32>
    %cst_5 = arith.constant 0.000000e+00 : f32
    %6 = vector.broadcast %cst_5 : f32 to vector<8x32xf32>
    %7 = arith.maximumf %5, %6 : vector<8x32xf32>
    %c0_6 = arith.constant 0 : index
    %c0_7 = arith.constant 0 : index
    %8 = vector.load %arg4[%c0_6, %c0_7] : memref<32x128xf32, #tpu.memory_space<vmem>>, vector<32x128xf32>
    %cst_8 = arith.constant dense<0.000000e+00> : vector<8x128xf32>
    %9 = tpu.matmul %7, %8, %cst_8 {dimension_numbers = #tpu.dot_dimension_numbers<[1], [0], [0], [1], [0, 0, 1, 1], [], []>} : vector<8x32xf32>, vector<32x128xf32>, vector<8x128xf32> -> vector<8x128xf32>
    %c0_9 = arith.constant 0 : index
    %c0_10 = arith.constant 0 : index
    %10 = vector.load %arg5[%c0_9, %c0_10] : memref<1x128xf32, #tpu.memory_space<vmem>>, vector<1x128xf32>
    %11 = vector.broadcast %10 : vector<1x128xf32> to vector<8x128xf32>
    %12 = arith.addf %9, %11 : vector<8x128xf32>
    %c0_11 = arith.constant 0 : index
    %c0_12 = arith.constant 0 : index
    %13 = vector.load %arg6[%c0_11, %c0_12] : memref<8x128xf32, #tpu.memory_space<vmem>>, vector<8x128xf32>
    tpu.vector_store %arg6[%c0_11, %c0_12], %12 {strides = array<i32>} : memref<8x128xf32, #tpu.memory_space<vmem>>, vector<8x128xf32>,
    return
  }
  func.func @transform_0(%arg0: i32) -> (i32, i32) {
    %c0_i32 = arith.constant 0 : i32
    %c0_i32_0 = arith.constant 0 : i32
    return %arg0, %c0_i32 : i32, i32
  }
  func.func @transform_1(%arg0: i32) -> (i32, i32) {
    %c0_i32 = arith.constant 0 : i32
    %c0_i32_0 = arith.constant 0 : i32
    %c0_i32_1 = arith.constant 0 : i32
    return %c0_i32, %c0_i32_0 : i32, i32
  }
  func.func @transform_2(%arg0: i32) -> (i32, i32) {
    %c0_i32 = arith.constant 0 : i32
    %c0_i32_0 = arith.constant 0 : i32
    %c0_i32_1 = arith.constant 0 : i32
    return %c0_i32, %c0_i32_0 : i32, i32
  }
  func.func @transform_3(%arg0: i32) -> (i32, i32) {
    %c0_i32 = arith.constant 0 : i32
    %c0_i32_0 = arith.constant 0 : i32
    %c0_i32_1 = arith.constant 0 : i32
    return %c0_i32, %c0_i32_0 : i32, i32
  }
  func.func @transform_4(%arg0: i32) -> (i32, i32) {
    %c0_i32 = arith.constant 0 : i32
    %c0_i32_0 = arith.constant 0 : i32
    %c0_i32_1 = arith.constant 0 : i32
    return %c0_i32, %c0_i32_0 : i32, i32
  }
  func.func @transform_5(%arg0: i32) -> (i32, i32) {
    %c0_i32 = arith.constant 0 : i32
    %c0_i32_0 = arith.constant 0 : i32
    return %arg0, %c0_i32 : i32, i32
  }
}

</mosaic_0001>

<bundles_post_ra>
// kernel: classifier_forward.1
= control target key start
LH: loop header
LB: loop body
LE: loop exit
PB: predicated region body
PF: predicated region fallthrough
CT: control target
= control target key end

     0   :  { %s201_s0 = inlined_call_operand.vmem [shape: f32[8,32], index: 0, kind: input, shape index: {}]   ;;  %s202_s1 = inlined_call_operand.vmem [shape: f32[32,32], index: 1, kind: input, shape index: {}]   ;;  %s203_s2 = inlined_call_operand.vmem [shape: f32[1,32], index: 2, kind: input, shape index: {}]   ;;  %s204_s3 = inlined_call_operand.vmem [shape: f32[32,128], index: 3, kind: input, shape index: {}]   ;;  %s205_s4 = inlined_call_operand.vmem [shape: f32[1,128], index: 4, kind: input, shape index: {}]   ;;  %s206_s5 = inlined_call_operand.hbm [shape: f32[8,128], index: 5, kind: output, shape index: {}]  }
   0x1   :  { %v25_v0 = vld [vmem:[%s202_s1 + $0x18] sm:$0xff]  ;;  %v24_v1 = vld [vmem:[%s202_s1 + $0x10] sm:$0xff]  ;;  %v23_v3 = vld [vmem:[%s202_s1 + $0x8] sm:$0xff] }
   0x2   :  { %46 = vmatpush.msra.mxu0 %v25_v0  ;;  %v58_v2 = vld [vmem:[%s204_s3 + $0x18] sm:$0xff] }
   0x3   :  { %78 = vmatpush.msra.mxu1 %v58_v2 }
   0x4   :  { %47 = vmatpush.msra.mxu0 %v24_v1 }
   0x5   :  { %10 = vsyncpa [#allocation3], 0  ;;  %v22_v4 = vld [vmem:[%s202_s1] sm:$0xff]  ;;  %vm30_vm0 = vcmask 261120   ;;  %v57_v6 = vld [vmem:[%s204_s3 + $0x10] sm:$0xff]  ;;  %s134_s13 = smov [#allocation2]  }
   0x6   :  { %48 = vmatpush.msra.mxu0 %v23_v3  ;;  %v21_v5 = vld [vmem:[%s201_s0] sm:$0xff]  ;;  %79 = vmatpush.msra.mxu1 %v57_v6  ;;  %v56_v7 = vld [vmem:[%s204_s3 + $0x8] sm:$0xff]  ;;  %s92_s14 = sshll.u32 %s134_s13, 4  ;;  %s94_s17 = sshll.u32 %s206_s5, 4  ;;  %s93_s14 = int_to_ptr.vmem [resolvable:$true] %s92_s14  ;;  %s95_s17 = int_to_ptr.hbm [resolvable:$true] %s94_s17 }
   0x7   :  { %v55_v8 = vld [vmem:[%s204_s3] sm:$0xff] }
   0x8   :  { %49 = vmatpush.msra.mxu0 %v22_v4  ;;  %80 = vmatpush.msra.mxu1 %v56_v7  ;;  %v106_v9 = vld [vmem:[%s203_s2] ss:$0 sm:$0xff] }
   0x9   :  { %103 = vmatmul.msk.f32.vlgmr.msra.gmra.mxu0 %vm30_vm0, %v21_v5  ;;  %v107_v13 = vld [vmem:[%s205_s4] ss:$0 sm:$0xff] }
   0xa   :  { %81 = vmatpush.msra.mxu1 %v55_v8 }
  0x86   :  { %v51_v10 = vpop.f32.mrf.mxu0 }
  0x87   :  { %v52_v11 = vadd.f32 %v106_v9, %v51_v10 }
  0x89   :  { %v54_v12 = vmax.f32 %v52_v11, 0.0 }
  0x8b   :  { %104 = vmatmul.msk.f32.vlgmr.msra.gmra.mxu1 %vm30_vm0, %v54_v12 }
 0x108   :  { %v83_v14 = vpop.f32.mrf.mxu1 }
 0x109   :  { %v84_v15 = vadd.f32 %v107_v13, %v83_v14 }
 0x10b   :  { %86 = vst [vmem:[#allocation2] sm:$0xff] %v84_v15 }
 0x10c   :  { %97 = dma.vmem_to_hbm [thread:$0]  %s93_s14, 128, %s95_s17, [#allocation3]  }
 0x10d   :  { %132 = dma.done.wait [#allocation3], 128  }
 0x10e   :  { %133 = vsyncadd [#allocation3], 4294967168 }
 0x10f   :  { %102 = vsyncpa [#allocation3], 1 }

</bundles_post_ra>
